<compile_context>
chip_gen: v5e
topology: v5e:2x2
jax: 0.10.0
libtpu: 0.0.40
codegen_flags: <defaults>
</compile_context>

<pallas_src>
import functools
import math

import jax
import jax.numpy as jnp
from jax import lax
from jax.experimental import pallas as pl
from jax.experimental.pallas import tpu as pltpu

_LANE = 128
_SUB = 8
_DEFAULT_TILE_ROWS = 8192          # (8192,128) f32 = 4 MiB/block; 2 in x 2 buf = 16 MiB
_CHUNK_ROWS = 1024                 # in-kernel compute slab (~0.5 MiB temporaries)
_VMEM_LIMIT_BYTES = 40 * 1024 * 1024  # fits v7x's 64 MiB/TC and lifts v5e's 16 MiB default


def _jac_kernel(x_ref, t_ref, inter_out, total_out, *,
                rows, tile_rows, chunk_rows, n_chunks,
                blocks_per_slice, total_blocks):
    c = pl.program_id(0)           # per-TensorCore slice (CORE_PARALLEL on v7x)
    i = pl.program_id(1)           # sequential reduction chunk within the slice

    @pl.when(i == 0)
    def _init():
        inter_out[...] = jnp.zeros_like(inter_out)
        total_out[...] = jnp.zeros_like(total_out)

    blk = c * blocks_per_slice + i
    last = total_blocks - 1

    def _accumulate(masked):
        # Static unroll over compute slabs of the (tile_rows, 128) block:
        # HBM DMA stays one big contiguous block, temporaries stay small.
        for k in range(n_chunks):
            r0 = k * chunk_rows
            x = x_ref[pl.ds(r0, chunk_rows), :].astype(jnp.float32)
            t = t_ref[pl.ds(r0, chunk_rows), :].astype(jnp.float32)
            # sigmoid = 1 / (1 + exp(-x)); exp lands on the EUP slot.
            s = pl.reciprocal(1.0 + jnp.exp(-x), approx=False)
            if masked:
                # Row-level validity (only the final real block runs this path);
                # row-index comparison avoids any int32 element-index overflow.
                row_ids = lax.broadcasted_iota(jnp.int32, (chunk_rows, _LANE), 0)
                valid = (blk * tile_rows + r0 + row_ids) < rows
                s = jnp.where(valid, s, 0.0)
                t = jnp.where(valid, t, 0.0)
            # Fold (chunk_rows,128) -> (8,128): cheap VPU adds; the cross-lane
            # reduce happens once in the wrapper epilogue.
            inter_out[...] += jnp.sum((s * t).reshape(-1, _SUB, _LANE), axis=0)
            total_out[...] += jnp.sum((s + t).reshape(-1, _SUB, _LANE), axis=0)

    # Hot path: full interior blocks, zero masking overhead.
    @pl.when(blk < last)
    def _full_blocks():
        _accumulate(masked=False)

    # Final (possibly ragged) block; clamped duplicate blocks (blk > last,
    # only possible with the multi-slice split) contribute nothing.
    @pl.when(blk == last)
    def _last_block():
        _accumulate(masked=True)


def _num_core_slices():
    """2 slices only on 2-TensorCore chips (v7x); single-TC chips get 1."""
    try:
        kind = jax.devices()[0].device_kind.lower()
    except Exception:
        kind = ""
    return 2 if ("v7" in kind or "tpu7" in kind) else 1


def jac_loss(inputs, targets, smooth=1.0, tile_rows=_DEFAULT_TILE_ROWS):
    """Pallas equivalent of JacLoss.forward: sigmoid + soft Jaccard loss."""
    assert inputs.shape == targets.shape
    n = math.prod(inputs.shape)
    x = inputs.reshape(-1)         # native dtype; f32 cast happens in-kernel
    t = targets.reshape(-1)

    # Sublane packing of the input dtype: 8 rows for f32, 16 for bf16, 32 for 8-bit.
    itemsize = max(1, jnp.dtype(inputs.dtype).itemsize)
    sub_rows = max(_SUB, 32 // itemsize)
    blk_elems = sub_rows * _LANE

    # Kernel consumes only the tile-aligned prefix (free reshape when already
    # aligned); the < blk_elems tail is folded in with plain JAX below.
    n_main = (n // blk_elems) * blk_elems

    intersection = jnp.float32(0.0)
    total = jnp.float32(0.0)

    if n_main:
        rows = n_main // _LANE
        tr = min(tile_rows, rows)
        tr = max(sub_rows, tr - tr % sub_rows)
        chunk_rows = _CHUNK_ROWS if tr % _CHUNK_ROWS == 0 else tr
        n_chunks = tr // chunk_rows
        total_blocks = -(-rows // tr)

        num_slices = min(_num_core_slices(), total_blocks)
        bps = -(-total_blocks // num_slices)
        if num_slices > 1:
            sem0 = getattr(pltpu, "CORE_PARALLEL", "parallel")
        else:
            sem0 = "arbitrary"

        x2 = x[:n_main].reshape(rows, _LANE)
        t2 = t[:n_main].reshape(rows, _LANE)

        def in_map(c, i):
            # Clamp so an over-run step of the last slice re-reads a valid
            # block; its contribution is skipped by the scalar gate in-kernel.
            return (jnp.minimum(c * bps + i, total_blocks - 1), 0)

        kernel = functools.partial(
            _jac_kernel, rows=rows, tile_rows=tr, chunk_rows=chunk_rows,
            n_chunks=n_chunks, blocks_per_slice=bps, total_blocks=total_blocks)

        inter_p, total_p = pl.pallas_call(
            kernel,
            out_shape=(
                jax.ShapeDtypeStruct((num_slices * _SUB, _LANE), jnp.float32),
                jax.ShapeDtypeStruct((num_slices * _SUB, _LANE), jnp.float32),
            ),
            grid_spec=pltpu.PrefetchScalarGridSpec(
                num_scalar_prefetch=0,
                grid=(num_slices, bps),
                in_specs=[
                    pl.BlockSpec((tr, _LANE), in_map),
                    pl.BlockSpec((tr, _LANE), in_map),
                ],
                out_specs=[
                    pl.BlockSpec((_SUB, _LANE), lambda c, i: (c, 0)),
                    pl.BlockSpec((_SUB, _LANE), lambda c, i: (c, 0)),
                ],
            ),
            compiler_params=pltpu.CompilerParams(
                dimension_semantics=(sem0, "arbitrary"),
                vmem_limit_bytes=_VMEM_LIMIT_BYTES),
        )(x2, t2)

        intersection = intersection + jnp.sum(inter_p)
        total = total + jnp.sum(total_p)

    if n_main < n:
        # Tiny unaligned tail (< sub_rows*128 elements): plain JAX.
        tx = x[n_main:].astype(jnp.float32)
        tt = t[n_main:].astype(jnp.float32)
        ts = jax.nn.sigmoid(tx)
        intersection = intersection + jnp.sum(ts * tt)
        total = total + jnp.sum(ts + tt)

    union = total - intersection
    iou = (intersection + smooth) / (union + smooth)
    return (1.0 - iou).astype(jnp.float32)


def _jac_loss_ref(inputs, targets, smooth=1.0):
    x = jax.nn.sigmoid(inputs.astype(jnp.float32)).reshape(-1)
    t = targets.astype(jnp.float32).reshape(-1)
    intersection = jnp.sum(x * t)
    total = jnp.sum(x + t)
    union = total - intersection
    iou = (intersection + smooth) / (union + smooth)
    return 1.0 - iou


if __name__ == "__main__":
    key = jax.random.PRNGKey(0)
    k_in, k_tg = jax.random.split(key)

    # NCHW-style logits and binary mask targets, as the PyTorch loss expects.
    inputs = jax.random.normal(k_in, (2, 4, 16, 16), dtype=jnp.float32)
    targets = (jax.random.uniform(k_tg, (2, 4, 16, 16)) > 0.5).astype(jnp.float32)

    loss = jac_loss(inputs, targets, smooth=1.0)
    jax.block_until_ready(loss)
    ref = _jac_loss_ref(inputs, targets, smooth=1.0)
    assert jnp.allclose(loss, ref, atol=1e-5, rtol=1e-5), (loss, ref)

    # Odd-sized input: exercises the ragged-last-block mask and the JAX tail.
    k2, k3 = jax.random.split(k_tg)
    inputs2 = jax.random.normal(k2, (2, 3, 15, 17), dtype=jnp.float32)
    targets2 = (jax.random.uniform(k3, (2, 3, 15, 17)) > 0.5).astype(jnp.float32)
    loss2 = jac_loss(inputs2, targets2, smooth=1.0)
    jax.block_until_ready(loss2)
    ref2 = _jac_loss_ref(inputs2, targets2, smooth=1.0)
    assert jnp.allclose(loss2, ref2, atol=1e-5, rtol=1e-5), (loss2, ref2)

    print("KERNEL_OK")
</pallas_src>

<mosaic_0001>
module attributes {stable_mosaic.version = 11 : i64} {
  func.func @_jac_kernel(%arg0: i32, %arg1: i32, %arg2: memref<16x128xf32, #tpu.memory_space<vmem>>, %arg3: memref<16x128xf32, #tpu.memory_space<vmem>>, %arg4: memref<8x128xf32, #tpu.memory_space<vmem>>, %arg5: memref<8x128xf32, #tpu.memory_space<vmem>>) attributes {dimension_semantics = [#tpu.dimension_semantics<arbitrary>, #tpu.dimension_semantics<arbitrary>], iteration_bounds = array<i64: 1, 1>, scalar_prefetch = 0 : i64, scratch_operands = 0 : i64, tpu.core_type = #tpu.core_type<tc>, window_params = [{transform_indices = @transform_0, window_bounds = array<i64: 16, 128>}, {transform_indices = @transform_1, window_bounds = array<i64: 16, 128>}, {transform_indices = @transform_2, window_bounds = array<i64: 8, 128>}, {transform_indices = @transform_3, window_bounds = array<i64: 8, 128>}]} {
    %c0_i32 = arith.constant 0 : i32
    %0 = arith.cmpi eq, %arg1, %c0_i32 : i32
    %1 = arith.extui %0 : i1 to i32
    %c0_i32_0 = arith.constant 0 : i32
    %2 = arith.cmpi ne, %1, %c0_i32_0 : i32
    scf.if %2 {
      %cst = arith.constant 0.000000e+00 : f32
      %11 = vector.broadcast %cst : f32 to vector<8x128xf32>
      %c0 = arith.constant 0 : index
      %c0_5 = arith.constant 0 : index
      %12 = vector.load %arg4[%c0, %c0_5] : memref<8x128xf32, #tpu.memory_space<vmem>>, vector<8x128xf32>
      tpu.vector_store %arg4[%c0, %c0_5], %11 {strides = array<i32>} : memref<8x128xf32, #tpu.memory_space<vmem>>, vector<8x128xf32>,
      %cst_6 = arith.constant 0.000000e+00 : f32
      %13 = vector.broadcast %cst_6 : f32 to vector<8x128xf32>
      %c0_7 = arith.constant 0 : index
      %c0_8 = arith.constant 0 : index
      %14 = vector.load %arg5[%c0_7, %c0_8] : memref<8x128xf32, #tpu.memory_space<vmem>>, vector<8x128xf32>
      tpu.vector_store %arg5[%c0_7, %c0_8], %13 {strides = array<i32>} : memref<8x128xf32, #tpu.memory_space<vmem>>, vector<8x128xf32>,
    } else {
    }
    %c1_i32 = arith.constant 1 : i32
    %3 = arith.muli %arg0, %c1_i32 : i32
    %4 = arith.addi %3, %arg1 : i32
    %c0_i32_1 = arith.constant 0 : i32
    %5 = arith.cmpi slt, %4, %c0_i32_1 : i32
    %6 = arith.extui %5 : i1 to i32
    %c0_i32_2 = arith.constant 0 : i32
    %7 = arith.cmpi ne, %6, %c0_i32_2 : i32
    scf.if %7 {
      %c0 = arith.constant 0 : index
      %c0_5 = arith.constant 0 : index
      %11 = vector.load %arg2[%c0, %c0_5] : memref<16x128xf32, #tpu.memory_space<vmem>>, vector<16x128xf32>
      %c0_6 = arith.constant 0 : index
      %c0_7 = arith.constant 0 : index
      %12 = vector.load %arg3[%c0_6, %c0_7] : memref<16x128xf32, #tpu.memory_space<vmem>>, vector<16x128xf32>
      %cst = arith.constant 0.000000e+00 : f32
      %13 = vector.broadcast %cst : f32 to vector<16x128xf32>
      %14 = arith.subf %13, %11 : vector<16x128xf32>
      %15 = math.exp %14 : vector<16x128xf32>
      %cst_8 = arith.constant 1.000000e+00 : f32
      %16 = vector.broadcast %cst_8 : f32 to vector<16x128xf32>
      %17 = arith.addf %16, %15 : vector<16x128xf32>
      %18 = tpu.reciprocal %17 : vector<16x128xf32> -> vector<16x128xf32>
      %c0_9 = arith.constant 0 : index
      %c0_10 = arith.constant 0 : index
      %19 = vector.load %arg4[%c0_9, %c0_10] : memref<8x128xf32, #tpu.memory_space<vmem>>, vector<8x128xf32>
      %20 = arith.mulf %18, %12 : vector<16x128xf32>
      %21 = vector.shape_cast %20 : vector<16x128xf32> to vector<2x8x128xf32>
      %cst_11 = arith.constant dense<0.000000e+00> : vector<8x128xf32>
      %22 = vector.multi_reduction <add>, %21, %cst_11 [0] : vector<2x8x128xf32> to vector<8x128xf32>
      %23 = arith.addf %19, %22 : vector<8x128xf32>
      %c0_12 = arith.constant 0 : index
      %c0_13 = arith.constant 0 : index
      %24 = vector.load %arg4[%c0_12, %c0_13] : memref<8x128xf32, #tpu.memory_space<vmem>>, vector<8x128xf32>
      tpu.vector_store %arg4[%c0_12, %c0_13], %23 {strides = array<i32>} : memref<8x128xf32, #tpu.memory_space<vmem>>, vector<8x128xf32>,
      %c0_14 = arith.constant 0 : index
      %c0_15 = arith.constant 0 : index
      %25 = vector.load %arg5[%c0_14, %c0_15] : memref<8x128xf32, #tpu.memory_space<vmem>>, vector<8x128xf32>
      %26 = arith.addf %18, %12 : vector<16x128xf32>
      %27 = vector.shape_cast %26 : vector<16x128xf32> to vector<2x8x128xf32>
      %cst_16 = arith.constant dense<0.000000e+00> : vector<8x128xf32>
      %28 = vector.multi_reduction <add>, %27, %cst_16 [0] : vector<2x8x128xf32> to vector<8x128xf32>
      %29 = arith.addf %25, %28 : vector<8x128xf32>
      %c0_17 = arith.constant 0 : index
      %c0_18 = arith.constant 0 : index
      %30 = vector.load %arg5[%c0_17, %c0_18] : memref<8x128xf32, #tpu.memory_space<vmem>>, vector<8x128xf32>
      tpu.vector_store %arg5[%c0_17, %c0_18], %29 {strides = array<i32>} : memref<8x128xf32, #tpu.memory_space<vmem>>, vector<8x128xf32>,
    } else {
    }
    %c0_i32_3 = arith.constant 0 : i32
    %8 = arith.cmpi eq, %4, %c0_i32_3 : i32
    %9 = arith.extui %8 : i1 to i32
    %c0_i32_4 = arith.constant 0 : i32
    %10 = arith.cmpi ne, %9, %c0_i32_4 : i32
    scf.if %10 {
      %c0 = arith.constant 0 : index
      %c0_5 = arith.constant 0 : index
      %11 = vector.load %arg2[%c0, %c0_5] : memref<16x128xf32, #tpu.memory_space<vmem>>, vector<16x128xf32>
      %c0_6 = arith.constant 0 : index
      %c0_7 = arith.constant 0 : index
      %12 = vector.load %arg3[%c0_6, %c0_7] : memref<16x128xf32, #tpu.memory_space<vmem>>, vector<16x128xf32>
      %cst = arith.constant 0.000000e+00 : f32
      %13 = vector.broadcast %cst : f32 to vector<16x128xf32>
      %14 = arith.subf %13, %11 : vector<16x128xf32>
      %15 = math.exp %14 : vector<16x128xf32>
      %cst_8 = arith.constant 1.000000e+00 : f32
      %16 = vector.broadcast %cst_8 : f32 to vector<16x128xf32>
      %17 = arith.addf %16, %15 : vector<16x128xf32>
      %18 = tpu.reciprocal %17 : vector<16x128xf32> -> vector<16x128xf32>
      %19 = tpu.iota {dimensions = array<i32: 0>} : vector<16x128xi32>
      %c16_i32 = arith.constant 16 : i32
      %20 = arith.muli %4, %c16_i32 : i32
      %c0_i32_9 = arith.constant 0 : i32
      %21 = arith.addi %20, %c0_i32_9 : i32
      %22 = vector.broadcast %21 : i32 to vector<16x128xi32>
      %23 = arith.addi %22, %19 : vector<16x128xi32>
      %c16_i32_10 = arith.constant 16 : i32
      %24 = vector.broadcast %c16_i32_10 : i32 to vector<16x128xi32>
      %25 = arith.cmpi slt, %23, %24 : vector<16x128xi32>
      %cst_11 = arith.constant 0.000000e+00 : f32
      %26 = vector.broadcast %cst_11 : f32 to vector<16x128xf32>
      %27 = arith.select %25, %18, %26 : vector<16x128xi1>, vector<16x128xf32>
      %cst_12 = arith.constant 0.000000e+00 : f32
      %28 = vector.broadcast %cst_12 : f32 to vector<16x128xf32>
      %29 = arith.select %25, %12, %28 : vector<16x128xi1>, vector<16x128xf32>
      %c0_13 = arith.constant 0 : index
      %c0_14 = arith.constant 0 : index
      %30 = vector.load %arg4[%c0_13, %c0_14] : memref<8x128xf32, #tpu.memory_space<vmem>>, vector<8x128xf32>
      %31 = arith.mulf %27, %29 : vector<16x128xf32>
      %32 = vector.shape_cast %31 : vector<16x128xf32> to vector<2x8x128xf32>
      %cst_15 = arith.constant dense<0.000000e+00> : vector<8x128xf32>
      %33 = vector.multi_reduction <add>, %32, %cst_15 [0] : vector<2x8x128xf32> to vector<8x128xf32>
      %34 = arith.addf %30, %33 : vector<8x128xf32>
      %c0_16 = arith.constant 0 : index
      %c0_17 = arith.constant 0 : index
      %35 = vector.load %arg4[%c0_16, %c0_17] : memref<8x128xf32, #tpu.memory_space<vmem>>, vector<8x128xf32>
      tpu.vector_store %arg4[%c0_16, %c0_17], %34 {strides = array<i32>} : memref<8x128xf32, #tpu.memory_space<vmem>>, vector<8x128xf32>,
      %c0_18 = arith.constant 0 : index
      %c0_19 = arith.constant 0 : index
      %36 = vector.load %arg5[%c0_18, %c0_19] : memref<8x128xf32, #tpu.memory_space<vmem>>, vector<8x128xf32>
      %37 = arith.addf %27, %29 : vector<16x128xf32>
      %38 = vector.shape_cast %37 : vector<16x128xf32> to vector<2x8x128xf32>
      %cst_20 = arith.constant dense<0.000000e+00> : vector<8x128xf32>
      %39 = vector.multi_reduction <add>, %38, %cst_20 [0] : vector<2x8x128xf32> to vector<8x128xf32>
      %40 = arith.addf %36, %39 : vector<8x128xf32>
      %c0_21 = arith.constant 0 : index
      %c0_22 = arith.constant 0 : index
      %41 = vector.load %arg5[%c0_21, %c0_22] : memref<8x128xf32, #tpu.memory_space<vmem>>, vector<8x128xf32>
      tpu.vector_store %arg5[%c0_21, %c0_22], %40 {strides = array<i32>} : memref<8x128xf32, #tpu.memory_space<vmem>>, vector<8x128xf32>,
    } else {
    }
    return
  }
  func.func @transform_0(%arg0: i32, %arg1: i32) -> (i32, i32) {
    %c1_i32 = arith.constant 1 : i32
    %0 = arith.muli %arg0, %c1_i32 : i32
    %1 = arith.addi %0, %arg1 : i32
    %c0_i32 = arith.constant 0 : i32
    %2 = arith.minsi %1, %c0_i32 : i32
    %c0_i32_0 = arith.constant 0 : i32
    %c0_i32_1 = arith.constant 0 : i32
    return %2, %c0_i32_0 : i32, i32
  }
  func.func @transform_1(%arg0: i32, %arg1: i32) -> (i32, i32) {
    %c1_i32 = arith.constant 1 : i32
    %0 = arith.muli %arg0, %c1_i32 : i32
    %1 = arith.addi %0, %arg1 : i32
    %c0_i32 = arith.constant 0 : i32
    %2 = arith.minsi %1, %c0_i32 : i32
    %c0_i32_0 = arith.constant 0 : i32
    %c0_i32_1 = arith.constant 0 : i32
    return %2, %c0_i32_0 : i32, i32
  }
  func.func @transform_2(%arg0: i32, %arg1: i32) -> (i32, i32) {
    %c0_i32 = arith.constant 0 : i32
    %c0_i32_0 = arith.constant 0 : i32
    return %arg0, %c0_i32 : i32, i32
  }
  func.func @transform_3(%arg0: i32, %arg1: i32) -> (i32, i32) {
    %c0_i32 = arith.constant 0 : i32
    %c0_i32_0 = arith.constant 0 : i32
    return %arg0, %c0_i32 : i32, i32
  }
}

</mosaic_0001>

<bundles_post_ra>
// kernel: tpu_custom_call.1
= control target key start
LH: loop header
LB: loop body
LE: loop exit
PB: predicated region body
PF: predicated region fallthrough
CT: control target
= control target key end

     0   :  { %9 = vsyncpa [#allocation3], 0  ;;  %s394_s0 = inlined_call_operand.hbm [shape: f32[16,128], index: 0, kind: input, shape index: {}]   ;;  %s395_s1 = inlined_call_operand.hbm [shape: f32[16,128], index: 1, kind: input, shape index: {}]   ;;  %s396_s2 = inlined_call_operand.hbm [shape: f32[8,128], index: 2, kind: output, shape index: {0}]   ;;  %s397_s3 = inlined_call_operand.hbm [shape: f32[8,128], index: 3, kind: output, shape index: {1}]  }
   0x1   :  { %10 = vsyncpa [#allocation6], 0 }
   0x2   :  { %11 = vsyncpa [#allocation4], 0 }
   0x3   :  { %12 = vsyncpa [#allocation9], 0  ;;  %s23_s14 = sshll.u32 %s394_s0, 4  ;;  %s356_s15 = smov [#allocation2]   ;;  %s24_s14 = int_to_ptr.hbm [resolvable:$true] %s23_s14 }
   0x4   :  { %s25_s16 = sshll.u32 %s356_s15, 4  ;;  %s42_s19 = sshll.u32 %s395_s1, 4  ;;  %s26_s16 = int_to_ptr.vmem [resolvable:$true] %s25_s16  ;;  %s43_s19 = int_to_ptr.hbm [resolvable:$true] %s42_s19 }
   0x5   :  { %s357_s20 = smov 128   ;;  %s358_s21 = smov 8  }
   0x6   :  { %31 = dma.hbm_to_vmem [thread:$0]  %s24_s14, 256, %s26_s16, [#allocation3], %s357_s20, %s357_s20, %s358_s21  }
   0x7   :  { %s359_s22 = smov [#allocation5]  }
   0x8   :  { %s44_s23 = sshll.u32 %s359_s22, 4  ;;  %s45_s23 = int_to_ptr.vmem [resolvable:$true] %s44_s23 }
   0x9   :  { %50 = dma.hbm_to_vmem [thread:$0]  %s43_s19, 256, %s45_s23, [#allocation6], %s357_s20, %s357_s20, %s358_s21  }
   0xa   :  { %348 = dma.done.wait [#allocation3], 256  }
   0xb   :  { %349 = vsyncadd [#allocation3], 4294967040 }
   0xc   :  { %350 = dma.done.wait [#allocation6], 256  }
   0xd   :  { %351 = vsyncadd [#allocation6], 4294967040  ;;  %v134_v0 = vld [vmem:[#allocation2] sm:$0xff]  ;;  %v135_v1 = vld [vmem:[#allocation2 + $0x8] sm:$0xff]  ;;  %s360_s0 = smov [#allocation7]   ;;  %s206_s26 = sshll.u32 %s396_s2, 4  ;;  %s207_s26 = int_to_ptr.hbm [resolvable:$true] %s206_s26 }
   0xe   :  { %v138_v2 = vsub.f32 0.0, %v134_v0  ;;  %v139_v3 = vsub.f32 0.0, %v135_v1  ;;  %v136_v25 = vld [vmem:[#allocation5] sm:$0xff]  ;;  %v137_v27 = vld [vmem:[#allocation5 + $0x8] sm:$0xff]  ;;  %s204_s1 = sshll.u32 %s360_s0, 4  ;;  %s361_s27 = smov [#allocation8]   ;;  %s205_s1 = int_to_ptr.vmem [resolvable:$true] %s204_s1 }
   0xf   :  { %s215_s28 = sshll.u32 %s361_s27, 4  ;;  %s217_s4 = sshll.u32 %s397_s3, 4  ;;  %s216_s28 = int_to_ptr.vmem [resolvable:$true] %s215_s28  ;;  %s218_s4 = int_to_ptr.hbm [resolvable:$true] %s217_s4 }
  0x10   :  { %v140_v4 = vmul.f32 1.442695, %v138_v2  ;;  %v142_v5 = vmul.f32 1.442695, %v139_v3 }
  0x12   :  { %244 = vpow2.f32 %v140_v4 }
  0x13   :  { %246 = vpow2.f32 %v142_v5 }
  0x18   :  { %v245_v6 = vpop.eup %244 }
  0x19   :  { %v247_v7 = vpop.eup %246  ;;  %v144_v8 = vadd.f32 1.0, %v245_v6 }
  0x1a   :  { %v145_v9 = vadd.f32 1.0, %v247_v7 }
  0x1b   :  { %248 = vrcp.f32 %v144_v8  ;;  %vm151_vm0 = vweird.f32 %v144_v8  ;;  %v157_v13 = vand.u32 2147483648, %v144_v8  ;;  %v155_v16 = vand.u32 2147483647, %v144_v8 }
  0x1c   :  { %250 = vrcp.f32 %v145_v9  ;;  %v171_v17 = vand.u32 2147483648, %v145_v9  ;;  %vm165_vm2 = vweird.f32 %v145_v9  ;;  %v169_v19 = vand.u32 2147483647, %v145_v9 }
  0x1d   :  { %v158_v21 = vor.u32 1.1754944e-38, %v157_v13  ;;  %vm156_vm5 = vcmp.eq.f32.partialorder %v155_v16, 8.507059e+37 }
  0x1e   :  { %v172_v24 = vor.u32 1.1754944e-38, %v171_v17  ;;  %vm170_vm7 = vcmp.eq.f32.partialorder %v169_v19, 8.507059e+37 }
  0x21   :  { %v249_v10 = vpop.eup %248 }
  0x22   :  { %v251_v11 = vpop.eup %250  ;;  %v147_v12 = vmul.f32 %v249_v10, %v144_v8  ;;  %vm152_vm1 = vweird.f32 %v249_v10 }
  0x23   :  { %v161_v14 = vmul.f32 %v251_v11, %v145_v9  ;;  %vm166_vm3 = vweird.f32 %v251_v11  ;;  %vm153_vm4 = vmor %vm151_vm0, %vm152_vm1 }
  0x24   :  { %v148_v15 = vsub.f32 1.0, %v147_v12  ;;  %vm167_vm6 = vmor %vm165_vm2, %vm166_vm3 }
  0x25   :  { %v162_v18 = vsub.f32 1.0, %v161_v14 }
  0x26   :  { %v149_v20 = vmul.f32 %v249_v10, %v148_v15 }
  0x27   :  { %v163_v22 = vmul.f32 %v251_v11, %v162_v18 }
  0x28   :  { %v150_v23 = vadd.f32 %v249_v10, %v149_v20 }
  0x29   :  { %v164_v26 = vadd.f32 %v251_v11, %v163_v22 }
  0x2a   :  { %v154_v28 = vsel %vm153_vm4, %v249_v10, %v150_v23 }
  0x2b   :  { %v159_v29 = vsel %vm156_vm5, %v158_v21, %v154_v28  ;;  %v168_v30 = vsel %vm167_vm6, %v251_v11, %v164_v26 }
  0x2c   :  { %v173_v31 = vsel %vm170_vm7, %v172_v24, %v168_v30  ;;  %v188_v32 = vmul.f32 %v159_v29, %v136_v25  ;;  %v194_v33 = vadd.f32 %v159_v29, %v136_v25 }
  0x2d   :  { %v189_v34 = vmul.f32 %v173_v31, %v137_v27  ;;  %v195_v35 = vadd.f32 %v173_v31, %v137_v27 }
  0x2f   :  { %v190_v36 = vadd.f32 %v189_v34, %v188_v32  ;;  %v196_v37 = vadd.f32 %v195_v35, %v194_v33 }
  0x31   :  { %192 = vst [vmem:[#allocation7] sm:$0xff] %v190_v36 }
  0x32   :  { %198 = vst [vmem:[#allocation8] sm:$0xff] %v196_v37  ;;  %209 = dma.vmem_to_hbm [thread:$0]  %s205_s1, 128, %s207_s26, [#allocation4]  }
  0x33   :  { %220 = dma.vmem_to_hbm [thread:$0]  %s216_s28, 128, %s218_s4, [#allocation9]  }
  0x34   :  { %352 = dma.done.wait [#allocation4], 128  }
  0x35   :  { %353 = vsyncadd [#allocation4], 4294967168 }
  0x36   :  { %354 = dma.done.wait [#allocation9], 128  }
  0x37   :  { %355 = vsyncadd [#allocation9], 4294967168 }
  0x38   :  { %229 = vsyncpa [#allocation3], 1 }
  0x39   :  { %230 = vsyncpa [#allocation6], 1 }
  0x3a   :  { %231 = vsyncpa [#allocation4], 1 }
  0x3b   :  { %232 = vsyncpa [#allocation9], 1 }

</bundles_post_ra>
